<compile_context>
chip_gen: v7x
topology: tpu7x:2x2x1
jax: 0.10.0
libtpu: 0.0.40
codegen_flags: <defaults>
</compile_context>

<pallas_src>
import math

import jax
import jax.numpy as jnp
from jax.experimental import pallas as pl
from jax.experimental.pallas import tpu as pltpu

_HI = jax.lax.Precision.HIGHEST


def _round_up(x, m):
    return ((x + m - 1) // m) * m


# ----------------------------------------------------------------------------
# Kernel: one affine transform + sigmoid on a lane-dense packed tile.
# ----------------------------------------------------------------------------
def generator_kernel(z_ref, w_ref, b_ref, o_ref):
    h = jnp.dot(z_ref[...], w_ref[...], preferred_element_type=jnp.float32)
    h = h + b_ref[...]                 # (1, pack*n) broadcasts over packed rows
    o_ref[...] = jax.nn.sigmoid(h)     # exp/recip on the EUP slot


# ----------------------------------------------------------------------------
# Wrapper-side parameter collapse + block-diagonal lane packing (done once).
# ----------------------------------------------------------------------------
def collapse_generator_params(params, n):
    """Fold Linear1 -> (identity) -> Linear2 -> (identity) -> Linear3 into a
    single (latent, n) affine map, then block-diagonal-pack `pack` copies so the
    packed output width pack*n is a multiple of 128 lanes (zero wasted lanes)."""
    w1, b1, w2, b2, w3, b3 = params
    W = jnp.dot(jnp.dot(w1, w2, precision=_HI), w3, precision=_HI)          # (latent, n)
    b = jnp.dot(jnp.dot(b1, w2, precision=_HI) + b2, w3, precision=_HI) + b3  # (1, n)

    pack = 128 // math.gcd(n, 128)     # smallest pack with (pack * n) % 128 == 0
    W_bd = jnp.kron(jnp.eye(pack, dtype=jnp.float32), W.astype(jnp.float32))
    b_t = jnp.tile(b.astype(jnp.float32), (1, pack))
    return W_bd, b_t, pack             # W_bd: (pack*latent, pack*n), b_t: (1, pack*n)


_ROW_TILE = 2048          # packed rows per grid step (multiple of 8, ~1 MiB out block)
_GRIDLESS_MAX_ROWS = 256  # above this, use the batch-parallel grid path


def generator_forward(z, W_bd, b_t, pack, win_size, n_feats):
    """z: (B, latent) f32; W_bd/b_t/pack from collapse_generator_params.
    Returns (B, win_size, n_feats) f32, matching the PyTorch forward."""
    B, latent = z.shape
    n = win_size * n_feats
    cols = pack * n

    # Pad batch to a multiple of the pack factor so the packed reshape is a
    # free contiguous view (row r of packed z = z[pack*r : pack*(r+1)] concat).
    B_pad = _round_up(max(B, pack), pack)
    if B_pad != B:
        z = jnp.pad(z, ((0, B_pad - B), (0, 0)))
    rows = B_pad // pack
    zp = z.reshape(rows, pack * latent)

    if rows <= _GRIDLESS_MAX_ROWS:
        # Small/moderate batch: everything resident in VMEM, no pipelining
        # machinery.  (For B <~ 128 a plain XLA matmul would also avoid the
        # custom-call launch cost; kept on the Pallas path here so the kernel
        # is exercised.)
        out = pl.pallas_call(
            generator_kernel,
            out_shape=jax.ShapeDtypeStruct((rows, cols), jnp.float32),
            in_specs=[
                pl.BlockSpec(memory_space=pltpu.MemorySpace.VMEM),
                pl.BlockSpec(memory_space=pltpu.MemorySpace.VMEM),
                pl.BlockSpec(memory_space=pltpu.MemorySpace.VMEM),
            ],
            out_specs=pl.BlockSpec(memory_space=pltpu.MemorySpace.VMEM),
        )(zp, W_bd, b_t)
    else:
        # Large batch: tile packed rows, keep weights resident, shard the batch
        # axis across TensorCores.  Tile capped so there are always >= 2 steps.
        tile = min(_ROW_TILE, _round_up(pl.cdiv(rows, 2), 8))
        out = pl.pallas_call(
            generator_kernel,
            out_shape=jax.ShapeDtypeStruct((rows, cols), jnp.float32),
            grid=(pl.cdiv(rows, tile),),
            in_specs=[
                pl.BlockSpec((tile, pack * latent), lambda i: (i, 0)),
                pl.BlockSpec((pack * latent, cols), lambda i: (0, 0)),
                pl.BlockSpec((1, cols), lambda i: (0, 0)),
            ],
            out_specs=pl.BlockSpec((tile, cols), lambda i: (i, 0)),
            compiler_params=pltpu.CompilerParams(
                dimension_semantics=("parallel",)),
        )(zp, W_bd, b_t)

    # Packed flat layout is bit-identical to the unpacked (B_pad, n) layout.
    flat = out.reshape(B_pad, n)
    if B_pad != B:
        flat = flat[:B]
    return flat.reshape(B, win_size, n_feats)


# ----------------------------------------------------------------------------
# Synthetic params + pure-JAX reference (original 3-layer structure).
# ----------------------------------------------------------------------------
def init_params(key, latent_dim, n_hidden, n):
    ks = jax.random.split(key, 6)
    # Stored as (in, out); biases as (1, out).
    w1 = jax.random.normal(ks[0], (latent_dim, n_hidden), jnp.float32) * 0.1
    b1 = jax.random.normal(ks[1], (1, n_hidden), jnp.float32) * 0.1
    w2 = jax.random.normal(ks[2], (n_hidden, n_hidden), jnp.float32) * 0.1
    b2 = jax.random.normal(ks[3], (1, n_hidden), jnp.float32) * 0.1
    w3 = jax.random.normal(ks[4], (n_hidden, n), jnp.float32) * 0.1
    b3 = jax.random.normal(ks[5], (1, n), jnp.float32) * 0.1
    return (w1, b1, w2, b2, w3, b3)


def reference_forward(z, params, win_size, n_feats):
    """Mirrors the PyTorch module layer-by-layer (LeakyReLU(True) => slope=1.0 == identity)."""
    w1, b1, w2, b2, w3, b3 = params
    h = jnp.dot(z, w1, precision=_HI) + b1
    h = jnp.dot(h, w2, precision=_HI) + b2
    h = jnp.dot(h, w3, precision=_HI) + b3
    h = jax.nn.sigmoid(h)
    return h.reshape(z.shape[0], win_size, n_feats)


if __name__ == "__main__":
    latent_dim = 32
    win_size = 8
    output_c = 4          # n_feats
    n_hidden = 16
    n = win_size * output_c

    key = jax.random.PRNGKey(0)
    k_p, k_z1, k_z2 = jax.random.split(key, 3)
    params = init_params(k_p, latent_dim, n_hidden, n)

    # Collapse + pack the MLP once (cached alongside the model params).
    W_bd, b_t, pack = collapse_generator_params(params, n)

    # --- Small batch (gridless, fully VMEM-resident path) ---------------------
    batch = 4
    z_small = jax.random.normal(k_z1, (batch, latent_dim), jnp.float32)
    out_small = jax.block_until_ready(
        generator_forward(z_small, W_bd, b_t, pack, win_size, output_c))
    ref_small = reference_forward(z_small, params, win_size, output_c)
    assert out_small.shape == (batch, win_size, output_c), out_small.shape
    assert jnp.allclose(out_small, ref_small, atol=1e-5, rtol=1e-5), \
        "small-batch mismatch vs reference"

    # --- Large batch (batch-parallel grid path, partial last block) -----------
    batch_big = 5000
    z_big = jax.random.normal(k_z2, (batch_big, latent_dim), jnp.float32)
    out_big = jax.block_until_ready(
        generator_forward(z_big, W_bd, b_t, pack, win_size, output_c))
    ref_big = reference_forward(z_big, params, win_size, output_c)
    assert out_big.shape == (batch_big, win_size, output_c), out_big.shape
    assert jnp.allclose(out_big, ref_big, atol=1e-5, rtol=1e-5), \
        "large-batch mismatch vs reference"

    print("KERNEL_OK")
</pallas_src>

<mosaic_0001>
module attributes {stable_mosaic.version = 11 : i64} {
  func.func @generator_kernel(%arg0: memref<1x128xf32, #tpu.memory_space<vmem>>, %arg1: memref<128x128xf32, #tpu.memory_space<vmem>>, %arg2: memref<1x128xf32, #tpu.memory_space<vmem>>, %arg3: memref<1x128xf32, #tpu.memory_space<vmem>>) attributes {dimension_semantics = [], scalar_prefetch = 0 : i64, scratch_operands = 0 : i64, tpu.core_type = #tpu.core_type<tc>} {
    %c0 = arith.constant 0 : index
    %c0_0 = arith.constant 0 : index
    %0 = vector.load %arg0[%c0, %c0_0] : memref<1x128xf32, #tpu.memory_space<vmem>>, vector<1x128xf32>
    %c0_1 = arith.constant 0 : index
    %c0_2 = arith.constant 0 : index
    %1 = vector.load %arg1[%c0_1, %c0_2] : memref<128x128xf32, #tpu.memory_space<vmem>>, vector<128x128xf32>
    %cst = arith.constant dense<0.000000e+00> : vector<1x128xf32>
    %2 = tpu.matmul %0, %1, %cst {dimension_numbers = #tpu.dot_dimension_numbers<[1], [0], [0], [1], [0, 0, 1, 1], [], []>} : vector<1x128xf32>, vector<128x128xf32>, vector<1x128xf32> -> vector<1x128xf32>
    %c0_3 = arith.constant 0 : index
    %c0_4 = arith.constant 0 : index
    %3 = vector.load %arg2[%c0_3, %c0_4] : memref<1x128xf32, #tpu.memory_space<vmem>>, vector<1x128xf32>
    %4 = arith.addf %2, %3 : vector<1x128xf32>
    %5 = arith.negf %4 : vector<1x128xf32>
    %6 = math.exp %5 : vector<1x128xf32>
    %cst_5 = arith.constant 1.000000e+00 : f32
    %7 = vector.broadcast %cst_5 : f32 to vector<1x128xf32>
    %8 = arith.addf %7, %6 : vector<1x128xf32>
    %9 = arith.divf %7, %8 : vector<1x128xf32>
    %c0_6 = arith.constant 0 : index
    %c0_7 = arith.constant 0 : index
    %10 = vector.load %arg3[%c0_6, %c0_7] : memref<1x128xf32, #tpu.memory_space<vmem>>, vector<1x128xf32>
    tpu.vector_store %arg3[%c0_6, %c0_7], %9 {strides = array<i32>} : memref<1x128xf32, #tpu.memory_space<vmem>>, vector<1x128xf32>,
    return
  }
}

</mosaic_0001>

<bundles_post_ra>
// kernel: tpu_custom_call.1
= control target key start
LH: loop header
LB: loop body
LE: loop exit
PB: predicated region body
PF: predicated region fallthrough
CT: control target
= control target key end

     0   :  { %8 = vsyncpa [#allocation3], 0  ;;  %s387_s0 = inlined_call_operand.hbm [shape: f32[1,128], index: 0, kind: input, shape index: {}]   ;;  %s388_s1 = inlined_call_operand.hbm [shape: f32[128,128], index: 1, kind: input, shape index: {}]   ;;  %s389_s2 = inlined_call_operand.vmem [shape: f32[1,128], index: 2, kind: input, shape index: {}]   ;;  %s390_s3 = inlined_call_operand.hbm [shape: f32[1,128], index: 3, kind: output, shape index: {}]  }
   0x1   :  { %9 = vsyncpa [#allocation6], 0 }
   0x2   :  { %10 = vsyncpa [#allocation4], 0  ;;  %s313_s12 = smov [#allocation2]   ;;  %s314_s14 = smov [#allocation5]  }
   0x3   :  { %s17_s13 = sshll.u32 %s313_s12, 4  ;;  %s26_s15 = sshll.u32 %s314_s14, 4  ;;  %s18_s13 = int_to_ptr.vmem [resolvable:$true] %s17_s13  ;;  %s341_s15 = int_to_ptr.vmem [resolvable:$true] %s26_s15 }
   0x4   :  { %s241_s18 = scalar_lea.hbm %s387_s0, 16 }
   0x5   :  { %p242_p0 = scmp.ne.s32.totalorder %s387_s0, %s241_s18  ;;  %p245_p1 = scmp.lt.u32.totalorder %s241_s18, %s387_s0 }
   0x7   :  { %p247_p2 = pnand %p245_p1, %p242_p0 }
   0x9   :  { %250 = shalt.err (!%p247_p2)
}
   0xa   :  { %s251_s23 = scalar_lea.vmem %s18_s13, 16  ;;  %s255_s24 = scalar_lea.vmem %s18_s13, 32 }
   0xb   :  { %p252_p3 = scmp.ne.s32.totalorder %s18_s13, %s251_s23  ;;  %p256_p4 = scmp.lt.s32.totalorder %s18_s13, %s18_s13 }
   0xc   :  { %p257_p5 = scmp.lt.s32.totalorder %s255_s24, %s251_s23 }
   0xe   :  { %p258_p6 = por %p257_p5, %p256_p4 }
  0x10   :  { %p259_p7 = pnand %p258_p6, %p252_p3 }
  0x12   :  { %262 = shalt.err (!%p259_p7)
}
  0x13   :  { %20 = dma.hbm_to_vmem [thread:$0]  %s387_s0, 16, %s18_s13, [#allocation3]  }
  0x14   :  { %s263_s29 = scalar_lea.hbm %s388_s1, 2048 }
  0x15   :  { %p264_p8 = scmp.ne.s32.totalorder %s388_s1, %s263_s29  ;;  %p267_p9 = scmp.lt.u32.totalorder %s263_s29, %s388_s1 }
  0x17   :  { %p269_p10 = pnand %p267_p9, %p264_p8 }
  0x19   :  { %272 = shalt.err (!%p269_p10)
}
  0x1a   :  { %s273_s7 = scalar_lea.vmem %s341_s15, 2048  ;;  %p278_p12 = scmp.lt.s32.totalorder %s341_s15, %s341_s15 }
  0x1b   :  { %p274_p11 = scmp.ne.s32.totalorder %s341_s15, %s273_s7  ;;  %p279_p13 = scmp.lt.s32.totalorder %s273_s7, %s273_s7 }
  0x1d   :  { %p280_p0 = por %p279_p13, %p278_p12 }
  0x1f   :  { %p281_p1 = pnand %p280_p0, %p274_p11 }
  0x21   :  { %284 = shalt.err (!%p281_p1)
}
  0x22   :  { %s315_s0 = smov 128   ;;  %s316_s8 = smov 8  }
  0x23   :  { %32 = dma.hbm_to_vmem [thread:$0]  %s388_s1, 2048, %s341_s15, [#allocation6], %s315_s0, %s315_s0, %s316_s8  }
  0x24   :  { %307 = dma.done.wait [#allocation3], 16  }
  0x25   :  { %308 = vsyncadd [#allocation3], 4294967280 }
  0x26   :  { %309 = dma.done.wait [#allocation6], 2048  }
  0x27   :  { %310 = vsyncadd [#allocation6], 4294965248  ;;  %v317_v0 = vmov 0.0|0.0   ;;  %vm318_vm0 = vmmov 0   ;;  %v319_v1 = vmov 0.0   ;;  %v42_v2 = vld [vmem:[#allocation5] sm:$0xff] }
  0x28   :  { %205 = vmatprep.subr.bf16.mxu0 %v317_v0  ;;  %202 = vmatprep.mubr.msk.f32.mxu0 %vm318_vm0, %v319_v1  ;;  %v43_v3 = vld [vmem:[#allocation5 + $0x8] sm:$0xff]  ;;  %v44_v4 = vld [vmem:[#allocation5 + $0x10] sm:$0xff]  ;;  %v45_v6 = vld [vmem:[#allocation5 + $0x18] sm:$0xff]  ;;  %s320_s12 = smov [#allocation7]  }
  0x29   :  { %v206_v5 = vpack.c.bf16 %v43_v3, %v42_v2  ;;  %v209_v7 = vpack.c.bf16 %v45_v6, %v44_v4  ;;  %v46_v8 = vld [vmem:[#allocation5 + $0x20] sm:$0xff]  ;;  %v47_v9 = vld [vmem:[#allocation5 + $0x28] sm:$0xff]  ;;  %v48_v11 = vld [vmem:[#allocation5 + $0x30] sm:$0xff]  ;;  %s142_s13 = sshll.u32 %s320_s12, 4  ;;  %s143_s13 = int_to_ptr.vmem [resolvable:$true] %s142_s13 }
  0x2a   :  { %v212_v10 = vpack.c.bf16 %v47_v9, %v46_v8  ;;  %v49_v12 = vld [vmem:[#allocation5 + $0x38] sm:$0xff]  ;;  %v50_v14 = vld [vmem:[#allocation5 + $0x40] sm:$0xff]  ;;  %v51_v15 = vld [vmem:[#allocation5 + $0x48] sm:$0xff]  ;;  %s285_s14 = scalar_lea.vmem %s143_s13, 16  ;;  %s289_s15 = scalar_lea.vmem %s143_s13, 32 }
  0x2b   :  { %207 = vmatpush3.bf16.msra.mxu0 %v206_v5  ;;  %v215_v13 = vpack.c.bf16 %v49_v12, %v48_v11  ;;  %v218_v16 = vpack.c.bf16 %v51_v15, %v50_v14  ;;  %v52_v17 = vld [vmem:[#allocation5 + $0x50] sm:$0xff]  ;;  %v53_v18 = vld [vmem:[#allocation5 + $0x58] sm:$0xff]  ;;  %v54_v20 = vld [vmem:[#allocation5 + $0x60] sm:$0xff]  ;;  %p286_p2 = scmp.ne.s32.totalorder %s143_s13, %s285_s14  ;;  %p290_p3 = scmp.lt.s32.totalorder %s143_s13, %s143_s13 }
  0x2c   :  { %208 = vmatprep.subr.bf16.mxu0 %v317_v0  ;;  %v221_v19 = vpack.c.bf16 %v53_v18, %v52_v17  ;;  %v55_v21 = vld [vmem:[#allocation5 + $0x68] sm:$0xff]  ;;  %v56_v23 = vld [vmem:[#allocation5 + $0x70] sm:$0xff]  ;;  %v57_v24 = vld [vmem:[#allocation5 + $0x78] sm:$0xff]  ;;  %p291_p4 = scmp.lt.s32.totalorder %s289_s15, %s285_s14 }
  0x2d   :  { %v224_v22 = vpack.c.bf16 %v55_v21, %v54_v20  ;;  %v227_v25 = vpack.c.bf16 %v57_v24, %v56_v23  ;;  %v41_v26 = vld [vmem:[#allocation2] sm:$0x1] }
  0x2e   :  { %v58_v27 = vld [vmem:[%s389_s2] sm:$0x1]  ;;  %p292_p5 = por %p291_p4, %p290_p3 }
  0x2f   :  { %210 = vmatpush3.bf16.msra.mxu0 %v209_v7 }
  0x30   :  { %211 = vmatprep.subr.bf16.mxu0 %v317_v0  ;;  %p293_p6 = pnand %p292_p5, %p286_p2 }
  0x33   :  { %213 = vmatpush3.bf16.msra.mxu0 %v212_v10 }
  0x34   :  { %214 = vmatprep.subr.bf16.mxu0 %v317_v0 }
  0x37   :  { %216 = vmatpush3.bf16.msra.mxu0 %v215_v13 }
  0x38   :  { %217 = vmatprep.subr.bf16.mxu0 %v317_v0 }
  0x3b   :  { %219 = vmatpush3.bf16.msra.mxu0 %v218_v16 }
  0x3c   :  { %220 = vmatprep.subr.bf16.mxu0 %v317_v0 }
  0x3f   :  { %222 = vmatpush3.bf16.msra.mxu0 %v221_v19 }
  0x40   :  { %223 = vmatprep.subr.bf16.mxu0 %v317_v0 }
  0x43   :  { %225 = vmatpush3.bf16.msra.mxu0 %v224_v22 }
  0x44   :  { %226 = vmatprep.subr.bf16.mxu0 %v317_v0 }
  0x47   :  { %228 = vmatpush3.bf16.msra.mxu0 %v227_v25 }
  0x4a   :  { %203 = vmatmul.mubr.f32.vlgmr.msra.gmra.mrb[0].mxu0 %v41_v26 }
 0x11d   :  { %v125_v28 = vpop.f32.mrb[0].mxu0 }
 0x11e   :  { %v126_v29 = vadd.f32 %v125_v28, %v58_v27  ;;  %v204_v30 = vpop.f32.mrb[1].mxu0 }
 0x120   :  { %v152_v31 = vmul.f32 -1.442695, %v126_v29 }
 0x122   :  { %237 = vpow2.f32 %v152_v31 }
 0x12c   :  { %v238_v32 = vpop.eup %237 }
 0x12d   :  { %v132_v33 = vadd.f32 1.0, %v238_v32 }
 0x12f   :  { %239 = vrcp.f32 %v132_v33 }
 0x139   :  { %v240_v34 = vpop.eup %239 }
 0x13a   :  { %135 = vst [vmem:[#allocation7] sm:$0x1] %v240_v34 }
 0x13b   :  { %296 = shalt.err (!%p293_p6)
}
 0x13c   :  { %s297_s17 = scalar_lea.hbm %s390_s3, 16 }
 0x13d   :  { %p298_p7 = scmp.ne.s32.totalorder %s390_s3, %s297_s17  ;;  %p301_p8 = scmp.lt.u32.totalorder %s297_s17, %s390_s3 }
 0x13f   :  { %p303_p9 = pnand %p301_p8, %p298_p7 }
 0x141   :  { %306 = shalt.err (!%p303_p9)
}
 0x142   :  { %145 = dma.vmem_to_hbm [thread:$0]  %s143_s13, 16, %s390_s3, [#allocation4]  }
 0x143   :  { %311 = dma.done.wait [#allocation4], 16  }
 0x144   :  { %312 = vsyncadd [#allocation4], 4294967280 }
 0x145   :  { %149 = vsyncpa [#allocation3], 1 }
 0x146   :  { %150 = vsyncpa [#allocation6], 1 }
 0x147   :  { %151 = vsyncpa [#allocation4], 1 }

</bundles_post_ra>
